<compile_context>
chip_gen: v7x
topology: tpu7x:2x2x1
jax: 0.10.0
libtpu: 0.0.40
codegen_flags: <defaults>
</compile_context>

<pallas_src>
import math
import jax
import jax.numpy as jnp
from jax.experimental import pallas as pl
from jax.experimental.pallas import tpu as pltpu


# ------------------------------------------------------------------ fused kernel

def simsiam_fused_kernel(x_ref, w_ref, b_ref, out_ref, loss_ref):
    """Fused backbone matmul + SimSiam loss.

    x_ref   : (N, D_IN)     f32  flattened raw input (augmentation folded into W)
    w_ref   : (D_IN, D_OUT) bf16 backbone weight with the 3x3 augmentation pre-folded
    b_ref   : (1, D_OUT)    f32  bias
    out_ref : (N, D_OUT)    f32  backbone features (== z == q: projector/predictor identity)
    loss_ref: (1, 1)        f32  scalar SimSiam loss
    """
    n = x_ref.shape[0]

    # ---- backbone: bf16 operands, f32 accumulation on the MXU ----
    out = jnp.dot(x_ref[...].astype(jnp.bfloat16), w_ref[...],
                  preferred_element_type=jnp.float32) + b_ref[...]
    out_ref[...] = out

    # ---- SimSiam loss;  q1 == z2 == q2 == z1 == out (aliasing in the torch module) ----
    sumsq = jnp.sum(out * out, axis=-1, keepdims=True)
    # F.normalize(p=2, eps=1e-12):  q / max(||q||, 1e-12)  ==  q * rsqrt(max(||q||^2, 1e-24))
    qn = out * jax.lax.rsqrt(jnp.maximum(sumsq, 1e-24))

    # (q*z).sum(-1) == diag of the similarity matrix (q aliases z).
    pos = jnp.sum(qn * qn, axis=-1, keepdims=True)                    # (n, 1)
    # Row-sum of the full similarity matrix without forming it:
    #   sum_j qn_i . qn_j  ==  qn_i . (sum_j qn_j)
    qsum = jnp.sum(qn, axis=0, keepdims=True)                         # (1, D) sublane reduce
    rowsum = jnp.sum(qn * qsum, axis=-1, keepdims=True)               # (n, 1) lane reduce
    offdiag = rowsum - pos                                            # masked-off-diagonal sum
    per_sample = pos - offdiag / (n - 1)                              # loss_fn(q, z)

    # loss = (loss_one + loss_two).mean();  loss_one == loss_two because q/z alias.
    loss_ref[...] = (2.0 / n) * jnp.sum(per_sample).reshape(1, 1)


# ------------------------------------------------------------------ wrapper

_VMEM = pl.BlockSpec(memory_space=pltpu.MemorySpace.VMEM)


def simsiam_fused(feat, w_aug_bf16, b):
    n = feat.shape[0]
    d_out = w_aug_bf16.shape[1]
    # Single block: N=2, D_IN=768, D_OUT=256 all fit comfortably in VMEM on v5e/v6e/v7x.
    # TODO(synk): for realistic D_IN (~1e5), K-tile the matmul with a grid + f32 VMEM
    # accumulator and size tiles per generation (v7x has only 64 MiB VMEM).
    return pl.pallas_call(
        simsiam_fused_kernel,
        out_shape=(jax.ShapeDtypeStruct((n, d_out), jnp.float32),
                   jax.ShapeDtypeStruct((1, 1), jnp.float32)),
        in_specs=[_VMEM, _VMEM, _VMEM],
        out_specs=(_VMEM, _VMEM),
    )(feat, w_aug_bf16, b)


# ------------------------------------------------------------------ params

def aug_rotate():
    a = math.radians(30)
    c, s = math.cos(a), math.sin(a)
    R_x = jnp.array([[1, 0, 0], [0, c, s], [0, -s, c]], jnp.float32).T
    R_y = jnp.array([[c, 0, -s], [0, 1, 0], [s, 0, c]], jnp.float32).T
    R_z = jnp.array([[c, s, 0], [-s, c, 0], [0, 0, 1]], jnp.float32).T
    return (R_x @ R_y) @ R_z


def aug_shear():
    return jnp.ones((3, 3), jnp.float32)          # sh_next = 1, transpose is a no-op


def aug_scale():
    return 2.0 * jnp.eye(3, dtype=jnp.float32)    # sc_next = 2


def make_params(din, dout):
    rotate_weight = (jnp.zeros((3, 3), jnp.float32)
                     .at[0, 0].set(1.0).at[1, 1].set(0.7).at[1, 2].set(0.7)
                     .at[2, 1].set(0.7).at[2, 2].set(0.7))
    shear_weight = jnp.full((3, 3), 0.8, jnp.float32)
    shear_weight = shear_weight.at[0, 0].set(1.0).at[1, 1].set(1.0).at[2, 2].set(1.0)
    scale_weight = (jnp.zeros((3, 3), jnp.float32)
                    .at[0, 0].set(0.6).at[1, 1].set(0.6).at[2, 2].set(0.6))

    W = 0.02 * jax.random.normal(jax.random.PRNGKey(42), (din, dout), jnp.float32)
    b = jnp.zeros((1, dout), jnp.float32)
    return dict(
        R_rotate=aug_rotate(), rotate_weight=rotate_weight,
        R_shear=aug_shear(), shear_weight=shear_weight,
        R_scale=aug_scale(), scale_weight=scale_weight,
        W=W, b=b,
    )


# ------------------------------------------------------------------ forward

def simsiam_forward(x, params):
    N, I, C, T, V, M = x.shape
    cc = C // 2
    assert cc == 3, "channel halves must be 3-d coordinates"
    assert N > 1, "SimSiam loss divides by N-1; need batch size > 1"

    # ---- compose the three weighted 3x3 augmentations (rotate -> shear -> scale) ----
    # per-point:  c_aug = c @ R_rot_w @ R_sh_w @ R_sc_w   (exact: linear map)
    R_comb = ((params["R_rotate"] * params["rotate_weight"])
              @ (params["R_shear"] * params["shear_weight"])
              @ (params["R_scale"] * params["scale_weight"]))

    # ---- fold the per-coordinate augmentation into the backbone weight (exact) ----
    # out = flatten(x_aug) @ W  ==  flatten(x) @ W_fold, with
    #   W_fold[i, h, k, p, :] = sum_j R_comb[k, j] * W[i, h, j, p, :]
    d_out = params["W"].shape[1]
    W_r = params["W"].reshape(I, 2, cc, T * V * M, d_out)
    W_fold = jnp.einsum("kj,ihjpd->ihkpd", R_comb, W_r).reshape(-1, d_out)

    # flatten is a free (row-major, contiguous) reshape — no transpose / HBM pass
    feat = x.reshape(N, -1).astype(jnp.float32)

    out1, loss = simsiam_fused(feat, W_fold.astype(jnp.bfloat16), params["b"])
    out2 = out1                          # x2 aliases x1 in the torch forward
    return loss[0, 0], out1, out2


# ------------------------------------------------------------------ main

if __name__ == "__main__":
    N, I, C, T, V, M = 2, 2, 6, 8, 4, 2
    D_OUT = 256
    D_IN = I * C * T * V * M             # 768

    x = jax.random.normal(jax.random.PRNGKey(0), (N, I, C, T, V, M), jnp.float32)
    params = make_params(D_IN, D_OUT)

    fwd = jax.jit(simsiam_forward)
    loss, out1, out2 = fwd(x, params)
    jax.block_until_ready((loss, out1, out2))

    assert out1.shape == (N, D_OUT) and out2.shape == (N, D_OUT)
    assert loss.shape == ()
    assert bool(jnp.isfinite(loss))
    print("KERNEL_OK")
</pallas_src>

<mosaic_0001>
module attributes {stable_mosaic.version = 11 : i64} {
  func.func @simsiam_fused_kernel(%arg0: memref<2x768xf32, #tpu.memory_space<vmem>>, %arg1: memref<768x256xbf16, #tpu.memory_space<vmem>>, %arg2: memref<1x256xf32, #tpu.memory_space<vmem>>, %arg3: memref<2x256xf32, #tpu.memory_space<vmem>>, %arg4: memref<1x1xf32, #tpu.memory_space<vmem>>) attributes {dimension_semantics = [], scalar_prefetch = 0 : i64, scratch_operands = 0 : i64, tpu.core_type = #tpu.core_type<tc>} {
    %c0 = arith.constant 0 : index
    %c0_0 = arith.constant 0 : index
    %0 = vector.load %arg0[%c0, %c0_0] : memref<2x768xf32, #tpu.memory_space<vmem>>, vector<2x768xf32>
    %1 = arith.truncf %0 : vector<2x768xf32> to vector<2x768xbf16>
    %c0_1 = arith.constant 0 : index
    %c0_2 = arith.constant 0 : index
    %2 = vector.load %arg1[%c0_1, %c0_2] : memref<768x256xbf16, #tpu.memory_space<vmem>>, vector<768x256xbf16>
    %cst = arith.constant dense<0.000000e+00> : vector<2x256xf32>
    %3 = tpu.matmul %1, %2, %cst {dimension_numbers = #tpu.dot_dimension_numbers<[1], [0], [0], [1], [0, 0, 1, 1], [], []>} : vector<2x768xbf16>, vector<768x256xbf16>, vector<2x256xf32> -> vector<2x256xf32>
    %c0_3 = arith.constant 0 : index
    %c0_4 = arith.constant 0 : index
    %4 = vector.load %arg2[%c0_3, %c0_4] : memref<1x256xf32, #tpu.memory_space<vmem>>, vector<1x256xf32>
    %5 = vector.broadcast %4 : vector<1x256xf32> to vector<2x256xf32>
    %6 = arith.addf %3, %5 : vector<2x256xf32>
    %c0_5 = arith.constant 0 : index
    %c0_6 = arith.constant 0 : index
    %7 = vector.load %arg3[%c0_5, %c0_6] : memref<2x256xf32, #tpu.memory_space<vmem>>, vector<2x256xf32>
    tpu.vector_store %arg3[%c0_5, %c0_6], %6 {strides = array<i32>} : memref<2x256xf32, #tpu.memory_space<vmem>>, vector<2x256xf32>,
    %8 = arith.mulf %6, %6 : vector<2x256xf32>
    %cst_7 = arith.constant dense<0.000000e+00> : vector<2xf32>
    %9 = vector.multi_reduction <add>, %8, %cst_7 [1] : vector<2x256xf32> to vector<2xf32>
    %10 = vector.shape_cast %9 : vector<2xf32> to vector<2x1xf32>
    %cst_8 = arith.constant 1.000000e-24 : f32
    %11 = vector.broadcast %cst_8 : f32 to vector<2x1xf32>
    %12 = arith.maximumf %10, %11 : vector<2x1xf32>
    %13 = math.rsqrt %12 : vector<2x1xf32>
    %14 = vector.broadcast %13 : vector<2x1xf32> to vector<2x256xf32>
    %15 = arith.mulf %6, %14 : vector<2x256xf32>
    %16 = arith.mulf %15, %15 : vector<2x256xf32>
    %cst_9 = arith.constant dense<0.000000e+00> : vector<2xf32>
    %17 = vector.multi_reduction <add>, %16, %cst_9 [1] : vector<2x256xf32> to vector<2xf32>
    %18 = vector.shape_cast %17 : vector<2xf32> to vector<2x1xf32>
    %cst_10 = arith.constant dense<0.000000e+00> : vector<256xf32>
    %19 = vector.multi_reduction <add>, %15, %cst_10 [0] : vector<2x256xf32> to vector<256xf32>
    %20 = vector.shape_cast %19 : vector<256xf32> to vector<1x256xf32>
    %21 = vector.broadcast %20 : vector<1x256xf32> to vector<2x256xf32>
    %22 = arith.mulf %15, %21 : vector<2x256xf32>
    %cst_11 = arith.constant dense<0.000000e+00> : vector<2xf32>
    %23 = vector.multi_reduction <add>, %22, %cst_11 [1] : vector<2x256xf32> to vector<2xf32>
    %24 = vector.shape_cast %23 : vector<2xf32> to vector<2x1xf32>
    %25 = arith.subf %24, %18 : vector<2x1xf32>
    %cst_12 = arith.constant 1.000000e+00 : f32
    %26 = vector.broadcast %cst_12 : f32 to vector<2x1xf32>
    %27 = arith.divf %25, %26 : vector<2x1xf32>
    %28 = arith.subf %18, %27 : vector<2x1xf32>
    %29 = vector.shape_cast %28 : vector<2x1xf32> to vector<1x2x1xf32>
    %cst_13 = arith.constant dense<0.000000e+00> : vector<1xf32>
    %30 = vector.multi_reduction <add>, %29, %cst_13 [1, 2] : vector<1x2x1xf32> to vector<1xf32>
    %31 = vector.shape_cast %30 : vector<1xf32> to vector<1x1x1xf32>
    %32 = vector.extract %31[0, 0, 0] : f32 from vector<1x1x1xf32>
    %33 = vector.broadcast %32 : f32 to vector<1x1xf32>
    %cst_14 = arith.constant 1.000000e+00 : f32
    %34 = vector.broadcast %cst_14 : f32 to vector<1x1xf32>
    %35 = arith.mulf %34, %33 : vector<1x1xf32>
    %c0_15 = arith.constant 0 : index
    %c0_16 = arith.constant 0 : index
    %36 = vector.load %arg4[%c0_15, %c0_16] : memref<1x1xf32, #tpu.memory_space<vmem>>, vector<1x1xf32>
    tpu.vector_store %arg4[%c0_15, %c0_16], %35 {strides = array<i32>} : memref<1x1xf32, #tpu.memory_space<vmem>>, vector<1x1xf32>,
    return
  }
}

</mosaic_0001>

<bundles_post_ra>
// kernel: simsiam_forward.1
= control target key start
LH: loop header
LB: loop body
LE: loop exit
PB: predicated region body
PF: predicated region fallthrough
CT: control target
= control target key end

     0   :  { %v1136_v10 = vmov 1983009808   ;;  %v25_v12 = vlaneseq  ;;  %s1506_s0 = inlined_call_operand.vmem [shape: f32[2,768], index: 0, kind: input, shape index: {}]   ;;  %s1507_s1 = inlined_call_operand.vmem [shape: bf16[768,256], index: 1, kind: input, shape index: {}]   ;;  %s1508_s2 = inlined_call_operand.vmem [shape: f32[1,256], index: 2, kind: input, shape index: {}]   ;;  %s1509_s3 = inlined_call_operand.vmem [shape: f32[2,256], index: 3, kind: output, shape index: {0}]   ;;  %s1510_s4 = inlined_call_operand.hbm [shape: f32[1,1], index: 4, kind: output, shape index: {1}]  }
   0x1   :  { %v965_v0 = vld [vmem:[%s1507_s1 + $0x104] ss:$8 sps:$4 sm:$0xff]   ;;  %v967_v1 = vld [vmem:[%s1507_s1 + $0x100] ss:$8 sps:$4 sm:$0xff]   ;;  %v968_v2 = vld [vmem:[%s1507_s1 + $0x114] ss:$8 sps:$4 sm:$0xff]   ;;  %v23_v11 = vunpack.c.l.s4 %v1136_v10 }
   0x2   :  { %687 = vmatprep.subr.bf16.mxu0 %v965_v0  ;;  %v970_v3 = vld [vmem:[%s1507_s1 + $0x110] ss:$8 sps:$4 sm:$0xff]   ;;  %v971_v4 = vld [vmem:[%s1507_s1 + $0x124] ss:$8 sps:$4 sm:$0xff]   ;;  %v973_v5 = vld [vmem:[%s1507_s1 + $0x120] ss:$8 sps:$4 sm:$0xff]  }
   0x3   :  { %688 = vmatpush1.bf16.msra.mxu0 %v967_v1  ;;  %v974_v6 = vld [vmem:[%s1507_s1 + $0x134] ss:$8 sps:$4 sm:$0xff]   ;;  %v976_v7 = vld [vmem:[%s1507_s1 + $0x130] ss:$8 sps:$4 sm:$0xff]   ;;  %v977_v8 = vld [vmem:[%s1507_s1 + $0x144] ss:$8 sps:$4 sm:$0xff]   ;;  %v24_v16 = vunpack.c.0.s8 %v23_v11 }
   0x4   :  { %689 = vmatprep.subr.bf16.mxu0 %v968_v2  ;;  %v979_v9 = vld [vmem:[%s1507_s1 + $0x140] ss:$8 sps:$4 sm:$0xff]   ;;  %v980_v13 = vld [vmem:[%s1507_s1 + $0x154] ss:$8 sps:$4 sm:$0xff]   ;;  %v982_v14 = vld [vmem:[%s1507_s1 + $0x150] ss:$8 sps:$4 sm:$0xff]  }
   0x5   :  { %v983_v15 = vld [vmem:[%s1507_s1 + $0x164] ss:$8 sps:$4 sm:$0xff]   ;;  %v1202_v17 = vshrl.u32 %v25_v12, 7  ;;  %v1012_v19 = vld [vmem:[%s1507_s1] ss:$8 sps:$4 sm:$0xff]  }
   0x6   :  { %v1010_v18 = vld [vmem:[%s1507_s1 + $0x4] ss:$8 sps:$4 sm:$0xff]   ;;  %v985_v20 = vld [vmem:[%s1507_s1 + $0x160] ss:$8 sps:$4 sm:$0xff]   ;;  %v986_v21 = vld [vmem:[%s1507_s1 + $0x174] ss:$8 sps:$4 sm:$0xff]  }
   0x7   :  { %690 = vmatpush1.bf16.msra.mxu0 %v970_v3  ;;  %646 = vmatprep.subr.bf16.mxu1 %v1010_v18  ;;  %v1016_v22 = vld [vmem:[%s1507_s1 + $0x14] ss:$8 sps:$4 sm:$0xff]   ;;  %v1018_v23 = vld [vmem:[%s1507_s1 + $0x10] ss:$8 sps:$4 sm:$0xff]   ;;  %v27_v24 = vsub.s32 %v24_v16, %v1202_v17  ;;  %v17_v25 = vld [vmem:[%s1506_s0] sm:$0xff] }
   0x8   :  { %691 = vmatprep.subr.bf16.mxu0 %v971_v4  ;;  %647 = vmatpush1.bf16.msra.mxu1 %v1012_v19  ;;  %v21_v26 = vcombine.high %v17_v25, %v17_v25  ;;  %v988_v28 = vld [vmem:[%s1507_s1 + $0x170] ss:$8 sps:$4 sm:$0xff]   ;;  %v1023_v29 = vld [vmem:[%s1507_s1 + $0x24] ss:$8 sps:$4 sm:$0xff]   ;;  %v1025_v31 = vld [vmem:[%s1507_s1 + $0x20] ss:$8 sps:$4 sm:$0xff]  }
   0x9   :  { %648 = vmatprep.subr.bf16.mxu1 %v1016_v22  ;;  %v1226_v27 = vrot.slane %v17_v25, %v27_v24  ;;  %v989_v33 = vld [vmem:[%s1507_s1 + $0x184] ss:$8 sps:$4 sm:$0xff]   ;;  %v1029_v35 = vld [vmem:[%s1507_s1 + $0x34] ss:$8 sps:$4 sm:$0xff]   ;;  %v991_v37 = vld [vmem:[%s1507_s1 + $0x180] ss:$8 sps:$4 sm:$0xff]  }
   0xa   :  { %v1234_v30 = vrot.slane %v21_v26, %v27_v24  ;;  %v992_v38 = vld [vmem:[%s1507_s1 + $0x194] ss:$8 sps:$4 sm:$0xff]   ;;  %v1031_v40 = vld [vmem:[%s1507_s1 + $0x30] ss:$8 sps:$4 sm:$0xff]   ;;  %v1035_v41 = vld [vmem:[%s1507_s1 + $0x44] ss:$8 sps:$4 sm:$0xff]  }
   0xb   :  { %692 = vmatpush1.bf16.msra.mxu0 %v973_v5  ;;  %v36_v32 = vcombine.high %v1226_v27, %v1226_v27  ;;  %v994_v42 = vld [vmem:[%s1507_s1 + $0x190] ss:$8 sps:$4 sm:$0xff]   ;;  %v995_v43 = vld [vmem:[%s1507_s1 + $0x1a4] ss:$8 sps:$4 sm:$0xff]   ;;  %v1037_v44 = vld [vmem:[%s1507_s1 + $0x40] ss:$8 sps:$4 sm:$0xff]  }
   0xc   :  { %693 = vmatprep.subr.bf16.mxu0 %v974_v6  ;;  %649 = vmatpush1.bf16.msra.mxu1 %v1018_v23  ;;  %v37_v34 = vcombine.high %v1234_v30, %v1234_v30  ;;  %v1041_v45 = vld [vmem:[%s1507_s1 + $0x54] ss:$8 sps:$4 sm:$0xff]   ;;  %v997_v46 = vld [vmem:[%s1507_s1 + $0x1a0] ss:$8 sps:$4 sm:$0xff]   ;;  %v1043_v48 = vld [vmem:[%s1507_s1 + $0x50] ss:$8 sps:$4 sm:$0xff]  }
   0xd   :  { %650 = vmatprep.subr.bf16.mxu1 %v1023_v29  ;;  %v53_v36 = vpack.c.bf16 %v36_v32, %v36_v32  ;;  %v998_v47 = vld [vmem:[%s1507_s1 + $0x1b4] ss:$8 sps:$4 sm:$0xff]   ;;  %v1047_v49 = vld [vmem:[%s1507_s1 + $0x64] ss:$8 sps:$4 sm:$0xff]   ;;  %v1000_v50 = vld [vmem:[%s1507_s1 + $0x1b0] ss:$8 sps:$4 sm:$0xff]  }
   0xe   :  { %v55_v39 = vpack.c.bf16 %v37_v34, %v37_v34  ;;  %v1001_v51 = vld [vmem:[%s1507_s1 + $0x1c4] ss:$8 sps:$4 sm:$0xff]   ;;  %v1049_v52 = vld [vmem:[%s1507_s1 + $0x60] ss:$8 sps:$4 sm:$0xff]   ;;  %v1053_v53 = vld [vmem:[%s1507_s1 + $0x74] ss:$8 sps:$4 sm:$0xff]  }
   0xf   :  { %694 = vmatpush1.bf16.msra.mxu0 %v976_v7  ;;  %678 = vmatprep.mubr.bf16.mxu1 %v53_v36  ;;  %v1003_v54 = vld [vmem:[%s1507_s1 + $0x1c0] ss:$8 sps:$4 sm:$0xff]   ;;  %v1004_v55 = vld [vmem:[%s1507_s1 + $0x1d4] ss:$8 sps:$4 sm:$0xff]   ;;  %v1055_v56 = vld [vmem:[%s1507_s1 + $0x70] ss:$8 sps:$4 sm:$0xff]   ;;  %v54_v7 = vpack.c.bf16 %v1234_v30, %v1234_v30 }
  0x10   :  { %695 = vmatprep.subr.bf16.mxu0 %v977_v8  ;;  %651 = vmatpush1.bf16.msra.mxu1 %v1025_v31  ;;  %v1059_v57 = vld [vmem:[%s1507_s1 + $0x84] ss:$8 sps:$4 sm:$0xff]   ;;  %v1006_v58 = vld [vmem:[%s1507_s1 + $0x1d0] ss:$8 sps:$4 sm:$0xff]   ;;  %v1061_v60 = vld [vmem:[%s1507_s1 + $0x80] ss:$8 sps:$4 sm:$0xff]  }
  0x11   :  { %652 = vmatprep.subr.bf16.mxu1 %v1029_v35  ;;  %719 = vmatprep.mubr.bf16.mxu0 %v55_v39  ;;  %v1007_v59 = vld [vmem:[%s1507_s1 + $0x1e4] ss:$8 sps:$4 sm:$0xff]   ;;  %v1065_v61 = vld [vmem:[%s1507_s1 + $0x94] ss:$8 sps:$4 sm:$0xff]   ;;  %v1009_v62 = vld [vmem:[%s1507_s1 + $0x1e0] ss:$8 sps:$4 sm:$0xff]  }
  0x12   :  { %v1013_v63 = vld [vmem:[%s1507_s1 + $0x1f4] ss:$8 sps:$4 sm:$0xff]   ;;  %v1067_v0 = vld [vmem:[%s1507_s1 + $0x90] ss:$8 sps:$4 sm:$0xff]   ;;  %v1071_v1 = vld [vmem:[%s1507_s1 + $0xa4] ss:$8 sps:$4 sm:$0xff]  }
  0x13   :  { %696 = vmatpush1.bf16.msra.mxu0 %v979_v9  ;;  %v1015_v2 = vld [vmem:[%s1507_s1 + $0x1f0] ss:$8 sps:$4 sm:$0xff]   ;;  %v1022_v3 = vld [vmem:[%s1507_s1 + $0x204] ss:$8 sps:$4 sm:$0xff]   ;;  %v1073_v4 = vld [vmem:[%s1507_s1 + $0xa0] ss:$8 sps:$4 sm:$0xff]  }
  0x14   :  { %697 = vmatprep.subr.bf16.mxu0 %v980_v13  ;;  %653 = vmatpush1.bf16.msra.mxu1 %v1031_v40  ;;  %v1077_v5 = vld [vmem:[%s1507_s1 + $0xb4] ss:$8 sps:$4 sm:$0xff]   ;;  %v1020_v6 = vld [vmem:[%s1507_s1 + $0x200] ss:$8 sps:$4 sm:$0xff]   ;;  %v1079_v9 = vld [vmem:[%s1507_s1 + $0xb0] ss:$8 sps:$4 sm:$0xff]  }
  0x15   :  { %654 = vmatprep.subr.bf16.mxu1 %v1035_v41  ;;  %v1028_v8 = vld [vmem:[%s1507_s1 + $0x214] ss:$8 sps:$4 sm:$0xff]   ;;  %v1083_v10 = vld [vmem:[%s1507_s1 + $0xc4] ss:$8 sps:$4 sm:$0xff]  }
  0x16   :  { %v1362_v11 = vld.sshfl [vmem:[%s1506_s0 + $0x8] sm:$0x33 pattern:$0x76325410] }
  0x17   :  { %698 = vmatpush1.bf16.msra.mxu0 %v982_v14  ;;  %v45_v12 = vcombine.high %v1362_v11, %v1362_v11 }
  0x18   :  { %699 = vmatprep.subr.bf16.mxu0 %v983_v15  ;;  %655 = vmatpush1.bf16.msra.mxu1 %v1037_v44 }
  0x19   :  { %656 = vmatprep.subr.bf16.mxu1 %v1041_v45 }
  0x1b   :  { %700 = vmatpush1.bf16.msra.mxu0 %v985_v20 }
  0x1c   :  { %701 = vmatprep.subr.bf16.mxu0 %v986_v21  ;;  %657 = vmatpush1.bf16.msra.mxu1 %v1043_v48 }
  0x1d   :  { %658 = vmatprep.subr.bf16.mxu1 %v1047_v49 }
  0x1f   :  { %702 = vmatpush1.bf16.msra.mxu0 %v988_v28 }
  0x20   :  { %703 = vmatprep.subr.bf16.mxu0 %v989_v33  ;;  %659 = vmatpush1.bf16.msra.mxu1 %v1049_v52 }
  0x21   :  { %660 = vmatprep.subr.bf16.mxu1 %v1053_v53 }
  0x23   :  { %704 = vmatpush1.bf16.msra.mxu0 %v991_v37 }
  0x24   :  { %705 = vmatprep.subr.bf16.mxu0 %v992_v38  ;;  %661 = vmatpush1.bf16.msra.mxu1 %v1055_v56 }
  0x25   :  { %662 = vmatprep.subr.bf16.mxu1 %v1059_v57 }
  0x27   :  { %706 = vmatpush1.bf16.msra.mxu0 %v994_v42 }
  0x28   :  { %707 = vmatprep.subr.bf16.mxu0 %v995_v43  ;;  %663 = vmatpush1.bf16.msra.mxu1 %v1061_v60 }
  0x29   :  { %664 = vmatprep.subr.bf16.mxu1 %v1065_v61 }
  0x2b   :  { %708 = vmatpush1.bf16.msra.mxu0 %v997_v46 }
  0x2c   :  { %709 = vmatprep.subr.bf16.mxu0 %v998_v47  ;;  %665 = vmatpush1.bf16.msra.mxu1 %v1067_v0 }
  0x2d   :  { %666 = vmatprep.subr.bf16.mxu1 %v1071_v1 }
  0x2f   :  { %710 = vmatpush1.bf16.msra.mxu0 %v1000_v50 }
  0x30   :  { %711 = vmatprep.subr.bf16.mxu0 %v1001_v51  ;;  %667 = vmatpush1.bf16.msra.mxu1 %v1073_v4 }
  0x31   :  { %668 = vmatprep.subr.bf16.mxu1 %v1077_v5 }
  0x33   :  { %712 = vmatpush1.bf16.msra.mxu0 %v1003_v54 }
  0x34   :  { %713 = vmatprep.subr.bf16.mxu0 %v1004_v55 }
  0x37   :  { %714 = vmatpush1.bf16.msra.mxu0 %v1006_v58 }
  0x38   :  { %715 = vmatprep.subr.bf16.mxu0 %v1007_v59 }
  0x3b   :  { %716 = vmatpush1.bf16.msra.mxu0 %v1009_v62 }
  0x3c   :  { %717 = vmatprep.subr.bf16.mxu0 %v1013_v63 }
  0x3f   :  { %718 = vmatpush1.bf16.msra.mxu0 %v1015_v2 }
  0x40   :  { %728 = vmatprep.subr.bf16.mxu0 %v1022_v3 }
  0x41   :  { %10 = vsyncpa [#allocation3], 0  ;;  %v1026_v13 = vld [vmem:[%s1507_s1 + $0x210] ss:$8 sps:$4 sm:$0xff]   ;;  %669 = vmatpush1.bf16.msra.mxu1 %v1079_v9  ;;  %v1085_v14 = vld [vmem:[%s1507_s1 + $0xc0] ss:$8 sps:$4 sm:$0xff]   ;;  %v57_v15 = vpack.c.bf16 %v45_v12, %v45_v12  ;;  %v52_v31 = vpack.c.bf16 %v1226_v27, %v1226_v27  ;;  %v56_v52 = vpack.c.bf16 %v1362_v11, %v1362_v11 }
  0x42   :  { %720 = vmatmul.mubr.bf16.vlgmr.msra.gmra.mrb[0].mxu0 %v54_v7  ;;  %v1034_v16 = vld [vmem:[%s1507_s1 + $0x224] ss:$8 sps:$4 sm:$0xff]   ;;  %670 = vmatprep.subr.bf16.mxu1 %v1083_v10  ;;  %v1089_v18 = vld [vmem:[%s1507_s1 + $0xd4] ss:$8 sps:$4 sm:$0xff]   ;;  %v1032_v19 = vld [vmem:[%s1507_s1 + $0x220] ss:$8 sps:$4 sm:$0xff]  }
  0x43   :  { %729 = vmatpush1.bf16.msra.mxu0 %v1020_v6  ;;  %760 = vmatprep.mubr.bf16.mxu0 %v57_v15  ;;  %v1091_v20 = vld [vmem:[%s1507_s1 + $0xd0] ss:$8 sps:$4 sm:$0xff]   ;;  %v1040_v21 = vld [vmem:[%s1507_s1 + $0x234] ss:$8 sps:$4 sm:$0xff]   ;;  %v1095_v22 = vld [vmem:[%s1507_s1 + $0xe4] ss:$8 sps:$4 sm:$0xff]  }
  0x44   :  { %730 = vmatprep.subr.bf16.mxu0 %v1028_v8  ;;  %v1038_v23 = vld [vmem:[%s1507_s1 + $0x230] ss:$8 sps:$4 sm:$0xff]   ;;  %v1097_v24 = vld [vmem:[%s1507_s1 + $0xe0] ss:$8 sps:$4 sm:$0xff]   ;;  %v1046_v25 = vld [vmem:[%s1507_s1 + $0x244] ss:$8 sps:$4 sm:$0xff]  }
  0x45   :  { %671 = vmatpush1.bf16.msra.mxu1 %v1085_v14  ;;  %v1101_v26 = vld [vmem:[%s1507_s1 + $0xf4] ss:$8 sps:$4 sm:$0xff]   ;;  %v1044_v28 = vld [vmem:[%s1507_s1 + $0x240] ss:$8 sps:$4 sm:$0xff]   ;;  %v1103_v29 = vld [vmem:[%s1507_s1 + $0xf0] ss:$8 sps:$4 sm:$0xff]  }
  0x46   :  { %672 = vmatprep.subr.bf16.mxu1 %v1089_v18  ;;  %v1052_v30 = vld [vmem:[%s1507_s1 + $0x254] ss:$8 sps:$4 sm:$0xff]   ;;  %v1050_v32 = vld [vmem:[%s1507_s1 + $0x250] ss:$8 sps:$4 sm:$0xff]   ;;  %v1058_v33 = vld [vmem:[%s1507_s1 + $0x264] ss:$8 sps:$4 sm:$0xff]  }
  0x47   :  { %731 = vmatpush1.bf16.msra.mxu0 %v1026_v13  ;;  %v1056_v34 = vld [vmem:[%s1507_s1 + $0x260] ss:$8 sps:$4 sm:$0xff]   ;;  %v1064_v27 = vld [vmem:[%s1507_s1 + $0x274] ss:$8 sps:$4 sm:$0xff]   ;;  %v1062_v35 = vld [vmem:[%s1507_s1 + $0x270] ss:$8 sps:$4 sm:$0xff]  }
  0x48   :  { %732 = vmatprep.subr.bf16.mxu0 %v1034_v16  ;;  %v1070_v36 = vld [vmem:[%s1507_s1 + $0x284] ss:$8 sps:$4 sm:$0xff]   ;;  %v1068_v37 = vld [vmem:[%s1507_s1 + $0x280] ss:$8 sps:$4 sm:$0xff]   ;;  %v1076_v38 = vld [vmem:[%s1507_s1 + $0x294] ss:$8 sps:$4 sm:$0xff]  }
  0x49   :  { %673 = vmatpush1.bf16.msra.mxu1 %v1091_v20  ;;  %v1074_v39 = vld [vmem:[%s1507_s1 + $0x290] ss:$8 sps:$4 sm:$0xff]   ;;  %v1082_v40 = vld [vmem:[%s1507_s1 + $0x2a4] ss:$8 sps:$4 sm:$0xff]   ;;  %v1080_v41 = vld [vmem:[%s1507_s1 + $0x2a0] ss:$8 sps:$4 sm:$0xff]  }
  0x4a   :  { %674 = vmatprep.subr.bf16.mxu1 %v1095_v22  ;;  %v1088_v42 = vld [vmem:[%s1507_s1 + $0x2b4] ss:$8 sps:$4 sm:$0xff]   ;;  %v1086_v43 = vld [vmem:[%s1507_s1 + $0x2b0] ss:$8 sps:$4 sm:$0xff]   ;;  %v1094_v44 = vld [vmem:[%s1507_s1 + $0x2c4] ss:$8 sps:$4 sm:$0xff]  }
  0x4b   :  { %733 = vmatpush1.bf16.msra.mxu0 %v1032_v19  ;;  %v1092_v45 = vld [vmem:[%s1507_s1 + $0x2c0] ss:$8 sps:$4 sm:$0xff]   ;;  %v1100_v46 = vld [vmem:[%s1507_s1 + $0x2d4] ss:$8 sps:$4 sm:$0xff]   ;;  %v1098_v47 = vld [vmem:[%s1507_s1 + $0x2d0] ss:$8 sps:$4 sm:$0xff]  }
  0x4c   :  { %734 = vmatprep.subr.bf16.mxu0 %v1040_v21  ;;  %v1106_v48 = vld [vmem:[%s1507_s1 + $0x2e4] ss:$8 sps:$4 sm:$0xff]   ;;  %v1104_v49 = vld [vmem:[%s1507_s1 + $0x2e0] ss:$8 sps:$4 sm:$0xff]   ;;  %v1109_v50 = vld [vmem:[%s1507_s1 + $0x2f4] ss:$8 sps:$4 sm:$0xff]  }
  0x4d   :  { %675 = vmatpush1.bf16.msra.mxu1 %v1097_v24  ;;  %v1107_v51 = vld [vmem:[%s1507_s1 + $0x2f0] ss:$8 sps:$4 sm:$0xff]   ;;  %v158_v57 = vsub.s32 0, %v1202_v17  ;;  %v154_v58 = vld [vmem:[%s1508_s2] sm:$0x3]  ;;  %v162_v59 = vsub.s32 1, %v1202_v17 }
  0x4e   :  { %676 = vmatprep.subr.bf16.mxu1 %v1101_v26  ;;  %vm783_vm0 = vcmask 1041408   ;;  %vm823_vm1 = vcmask 1024   ;;  %vm835_vm2 = vcmask 0  }
  0x4f   :  { %735 = vmatpush1.bf16.msra.mxu0 %v1038_v23  ;;  %v159_v60 = vrot.slane %v154_v58, %v158_v57  ;;  %v163_v61 = vrot.slane %v154_v58, %v162_v59 }
  0x50   :  { %736 = vmatprep.subr.bf16.mxu0 %v1046_v25 }
  0x51   :  { %677 = vmatpush1.bf16.msra.mxu1 %v1103_v29 }
  0x53   :  { %737 = vmatpush1.bf16.msra.mxu0 %v1044_v28 }
  0x54   :  { %738 = vmatprep.subr.bf16.mxu0 %v1052_v30  ;;  %679 = vmatmul.mubr.bf16.vlgmr.msra.gmra.mrb[0].mxu1 %v52_v31 }
  0x57   :  { %739 = vmatpush1.bf16.msra.mxu0 %v1050_v32 }
  0x58   :  { %740 = vmatprep.subr.bf16.mxu0 %v1058_v33 }
  0x5b   :  { %741 = vmatpush1.bf16.msra.mxu0 %v1056_v34 }
  0x5c   :  { %742 = vmatprep.subr.bf16.mxu0 %v1064_v27 }
  0x5f   :  { %743 = vmatpush1.bf16.msra.mxu0 %v1062_v35 }
  0x60   :  { %744 = vmatprep.subr.bf16.mxu0 %v1070_v36 }
  0x63   :  { %745 = vmatpush1.bf16.msra.mxu0 %v1068_v37 }
  0x64   :  { %746 = vmatprep.subr.bf16.mxu0 %v1076_v38 }
  0x67   :  { %747 = vmatpush1.bf16.msra.mxu0 %v1074_v39 }
  0x68   :  { %748 = vmatprep.subr.bf16.mxu0 %v1082_v40 }
  0x6b   :  { %749 = vmatpush1.bf16.msra.mxu0 %v1080_v41 }
  0x6c   :  { %750 = vmatprep.subr.bf16.mxu0 %v1088_v42 }
  0x6f   :  { %751 = vmatpush1.bf16.msra.mxu0 %v1086_v43 }
  0x70   :  { %752 = vmatprep.subr.bf16.mxu0 %v1094_v44 }
  0x73   :  { %753 = vmatpush1.bf16.msra.mxu0 %v1092_v45 }
  0x74   :  { %754 = vmatprep.subr.bf16.mxu0 %v1100_v46 }
  0x77   :  { %755 = vmatpush1.bf16.msra.mxu0 %v1098_v47 }
  0x78   :  { %756 = vmatprep.subr.bf16.mxu0 %v1106_v48 }
  0x7b   :  { %757 = vmatpush1.bf16.msra.mxu0 %v1104_v49 }
  0x7c   :  { %758 = vmatprep.subr.bf16.mxu0 %v1109_v50 }
  0x7f   :  { %759 = vmatpush1.bf16.msra.mxu0 %v1107_v51 }
  0x82   :  { %761 = vmatmul.mubr.bf16.vlgmr.msra.gmra.mrb[0].mxu0 %v56_v52 }
 0x127   :  { %v680_v53 = vpop.f32.mrb[0].mxu1 }
 0x128   :  { %v682_v54 = vpop.f32.mrb[1].mxu1  ;;  %v681_v62 = vadd.f32 %v680_v53, %v159_v60 }
 0x129   :  { %v684_v55 = vpop.f32.mrb[2].mxu1  ;;  %v683_v63 = vadd.f32 %v682_v54, %v163_v61 }
 0x12a   :  { %v685_v56 = vpop.f32.mrb[3].mxu1 }
 0x155   :  { %v762_v0 = vpop.f32.mrb[0].mxu0 }
 0x156   :  { %v954_v1 = vadd.f32 %v762_v0, %v681_v62  ;;  %v764_v2 = vpop.f32.mrb[1].mxu0 }
 0x157   :  { %v956_v3 = vadd.f32 %v764_v2, %v683_v63  ;;  %v766_v4 = vpop.f32.mrb[2].mxu0 }
 0x158   :  { %v767_v5 = vpop.f32.mrb[3].mxu0  ;;  %v781_v6 = vmul.f32 %v954_v1, %v954_v1 }
 0x159   :  { %v771_v7 = vcombine.low %v954_v1, %v956_v3  ;;  %v782_v8 = vmul.f32 %v956_v3, %v956_v3 }
 0x15a   :  { %v784_v9 = vsel %vm783_vm0, %v781_v6, 0.0 }
 0x15b   :  { %952 = vst.sshfl [vmem:[%s1509_s3] sm:$0x33 pattern:$0x76325410] %v771_v7  ;;  %v785_v17 = vsel %vm783_vm0, %v782_v8, 0.0  ;;  %s1137_s3 = smov [#allocation2]  }
 0x15c   :  { %v786_v10 = vadd.f32 %v785_v17, %v784_v9  ;;  %s845_s28 = sshll.u32 %s1137_s3, 4  ;;  %s846_s28 = int_to_ptr.vmem [resolvable:$true] %s845_s28 }
 0x15d   :  { %s1112_s30 = scalar_lea.vmem %s846_s28, 16  ;;  %s1116_s5 = scalar_lea.vmem %s846_s28, 32 }
 0x15e   :  { %787 = vadd.xlane.f32.xlu0 %v786_v10  ;;  %p1113_p0 = scmp.ne.s32.totalorder %s846_s28, %s1112_s30  ;;  %p1117_p1 = scmp.lt.s32.totalorder %s846_s28, %s846_s28 }
 0x15f   :  { %p1118_p2 = scmp.lt.s32.totalorder %s1116_s5, %s1112_s30 }
 0x161   :  { %p1119_p3 = por %p1118_p2, %p1117_p1 }
 0x163   :  { %p1120_p4 = pnand %p1119_p3, %p1113_p0 }
 0x1eb   :  { %v788_v11 = vpop.xlane.xlu0 %787 }
 0x1ec   :  { %v789_v12 = vmax.f32 %v788_v11, 1e-24 }
 0x1ee   :  { %1110 = vrsqrt.f32 %v789_v12 }
 0x1f8   :  { %v1111_v13 = vpop.eup %1110 }
 0x1f9   :  { %v791_v14 = vmul.f32 %v1111_v13, %v954_v1  ;;  %v792_v15 = vmul.f32 %v1111_v13, %v956_v3 }
 0x1fb   :  { %v793_v16 = vmul.f32 %v791_v14, %v791_v14  ;;  %v794_v18 = vmul.f32 %v792_v15, %v792_v15  ;;  %v800_v19 = vsel %vm783_vm0, %v791_v14, 0.0  ;;  %v807_v20 = vsel %vm783_vm0, %v792_v15, 0.0 }
 0x1fc   :  { %v801_v21 = vrot.slane %v800_v19, 4  ;;  %v808_v22 = vrot.slane %v807_v20, 4 }
 0x1fd   :  { %v795_v23 = vsel %vm783_vm0, %v793_v16, 0.0  ;;  %v796_v24 = vsel %vm783_vm0, %v794_v18, 0.0 }
 0x1fe   :  { %v797_v25 = vadd.f32 %v796_v24, %v795_v23  ;;  %v802_v26 = vadd.f32 %v801_v21, %v800_v19  ;;  %v809_v28 = vadd.f32 %v808_v22, %v807_v20 }
 0x200   :  { %798 = vadd.xlane.f32.xlu0 %v797_v25  ;;  %v803_v29 = vrot.slane %v802_v26, 2  ;;  %v810_v30 = vrot.slane %v809_v28, 2 }
 0x202   :  { %v804_v31 = vadd.f32 %v803_v29, %v802_v26  ;;  %v811_v32 = vadd.f32 %v810_v30, %v809_v28 }
 0x204   :  { %v805_v33 = vrot.slane %v804_v31, 1  ;;  %v812_v34 = vrot.slane %v811_v32, 1 }
 0x206   :  { %v806_v27 = vadd.f32 %v805_v33, %v804_v31  ;;  %v813_v35 = vadd.f32 %v812_v34, %v811_v32 }
 0x208   :  { %v814_v36 = vmul.f32 %v806_v27, %v791_v14  ;;  %v815_v37 = vmul.f32 %v813_v35, %v792_v15 }
 0x20a   :  { %v816_v38 = vsel %vm783_vm0, %v814_v36, 0.0  ;;  %v817_v39 = vsel %vm783_vm0, %v815_v37, 0.0 }
 0x20b   :  { %v818_v40 = vadd.f32 %v817_v39, %v816_v38 }
 0x20d   :  { %819 = vadd.xlane.f32.xlu1 %v818_v40 }
 0x28d   :  { %v799_v41 = vpop.xlane.xlu0 %798 }
 0x29a   :  { %v820_v42 = vpop.xlane.xlu1 %819 }
 0x29b   :  { %v821_v43 = vsub.f32 %v820_v42, %v799_v41 }
 0x29d   :  { %v822_v44 = vsub.f32 %v799_v41, %v821_v43 }
 0x29f   :  { %v824_v45 = vsel %vm823_vm1, %v822_v44, 0.0 }
 0x2a0   :  { %825 = vadd.xlane.f32.xlu1 %v824_v45 }
 0x32d   :  { %v826_v46 = vpop.xlane.xlu1 %825 }
 0x32e   :  { %v827_v47 = vrot.slane %v826_v46, 4 }
 0x330   :  { %v828_v48 = vadd.f32 %v827_v47, %v826_v46 }
 0x332   :  { %v829_v49 = vrot.slane %v828_v48, 2 }
 0x334   :  { %v830_v50 = vadd.f32 %v829_v49, %v828_v48 }
 0x336   :  { %v831_v51 = vrot.slane %v830_v50, 1 }
 0x338   :  { %v832_v52 = vadd.f32 %v831_v51, %v830_v50 }
 0x33a   :  { %961 = vpush %v832_v52 }
 0x36b   :  { %s962_s29 = spop %961 }
 0x36c   :  { %v834_v53 = vstv %s962_s29 }
 0x36d   :  { %836 = vst.msk [vmem:[#allocation2] sm:$0x1] %vm835_vm2, %v834_v53 }
 0x36e   :  { %1123 = shalt.err (!%p1120_p4)
}
 0x36f   :  { %s1124_s8 = scalar_lea.hbm %s1510_s4, 16 }
 0x370   :  { %p1125_p5 = scmp.ne.s32.totalorder %s1510_s4, %s1124_s8  ;;  %p1128_p6 = scmp.lt.u32.totalorder %s1124_s8, %s1510_s4 }
 0x372   :  { %p1130_p7 = pnand %p1128_p6, %p1125_p5 }
 0x374   :  { %1133 = shalt.err (!%p1130_p7)
}
 0x375   :  { %848 = dma.vmem_to_hbm [thread:$0]  %s846_s28, 16, %s1510_s4, [#allocation3]  }
 0x376   :  { %1134 = dma.done.wait [#allocation3], 16  }
 0x377   :  { %1135 = vsyncadd [#allocation3], 4294967280 }
 0x378   :  { %854 = vsyncpa [#allocation3], 1 }

</bundles_post_ra>
